<compile_context>
chip_gen: v7x
topology: tpu7x:2x2x1
jax: 0.10.0
libtpu: 0.0.40
codegen_flags: <defaults>
</compile_context>

<pallas_src>
import functools

import jax
import jax.numpy as jnp
from jax.experimental import pallas as pl
from jax.experimental.pallas import tpu as pltpu


# ----------------------------- helpers --------------------------------------

def _round_up(x, m):
    return ((x + m - 1) // m) * m


# ------------------- precursor kernel: MLP tower + GMF -----------------------

def _vec_kernel(num_fc, *refs):
    """refs = (mlp_in, umf, imf, W0, b0, ..., W_{n-1}, b_{n-1}, x_out, mf_out)."""
    mlp_ref, umf_ref, imf_ref = refs[0], refs[1], refs[2]
    fc_refs = refs[3:3 + 2 * num_fc]
    x_out_ref = refs[3 + 2 * num_fc]
    mf_out_ref = refs[4 + 2 * num_fc]

    x = mlp_ref[...]
    for i in range(num_fc):
        w = fc_refs[2 * i][...]
        b = fc_refs[2 * i + 1][...]            # (1, out) -> broadcasts
        x = jnp.dot(x, w, preferred_element_type=jnp.float32) + b
        x = jnp.maximum(x, 0.0)
    mf = umf_ref[...] * imf_ref[...]

    x_out_ref[...] = x.astype(x_out_ref.dtype)
    mf_out_ref[...] = mf.astype(mf_out_ref.dtype)


# --------------------- main kernel: streamed affine + sigmoid ----------------

def _affine_kernel(x_ref, mf_ref, wt_ref, wb_ref, ba_ref, out_ref):
    logits = (jnp.dot(x_ref[...], wt_ref[...], preferred_element_type=jnp.float32)
              + jnp.dot(mf_ref[...], wb_ref[...], preferred_element_type=jnp.float32)
              + ba_ref[...])
    # sigmoid(x) == 0.5 * tanh(0.5 * x) + 0.5 : single EUP op per element.
    out_ref[...] = (0.5 * jnp.tanh(0.5 * logits) + 0.5).astype(out_ref.dtype)


# ----------------------------- wrapper ---------------------------------------

def neumf_forward(params, user_indices, item_indices, *, tb=None, tn=None):
    """Runs the NeuMF forward pass. Returns bf16 sigmoid ratings [B, num_items]."""
    # --- glue: embedding gathers + first concat (pure indexing / reshape) ---
    ue_mlp = jnp.take(params["emb_user_mlp"], user_indices, axis=0)
    ie_mlp = jnp.take(params["emb_item_mlp"], item_indices, axis=0)
    ue_mf = jnp.take(params["emb_user_mf"], user_indices, axis=0)
    ie_mf = jnp.take(params["emb_item_mf"], item_indices, axis=0)
    mlp_in = jnp.concatenate([ue_mlp, ie_mlp], axis=-1)      # [B, layers[0]]

    fc_ws = params["fc_ws"]        # list of [in, out]
    fc_bs = params["fc_bs"]        # list of [1, out]
    num_fc = len(fc_ws)

    wa = params["wa"]              # [layers[-1] + F, num_items]
    ba = params["ba"]              # [1, num_items]

    B, L0 = mlp_in.shape
    F = ue_mf.shape[1]
    LF, num_items = wa.shape
    H = LF - F                     # layers[-1]

    # --- padding / tile sizes -------------------------------------------------
    # Batch padded to a multiple of 16 (bf16-native sublane count); items padded
    # only to a multiple of 128 (tight padding), partial last tile via cdiv grid.
    B_pad = _round_up(B, 16)
    N_pad = _round_up(num_items, 128)
    if tb is None:
        tb = min(512, B_pad)
    if tn is None:
        tn = min(4096, N_pad)
    tb = min(tb, B_pad)
    tn = min(tn, N_pad)
    nb = pl.cdiv(B_pad, tb)
    nj = pl.cdiv(N_pad, tn)

    def pad_rows(x):
        return jnp.pad(x, ((0, B_pad - B), (0, 0))) if B_pad != B else x

    mlp_in_p = pad_rows(mlp_in)
    ue_mf_p = pad_rows(ue_mf)
    ie_mf_p = pad_rows(ie_mf)

    # bf16 weights for the wide final projection: halves the dominant weight
    # stream; accumulation stays f32 inside the kernel.  Split into the MLP
    # segment and the MF segment (avoids any in-kernel concat of sub-128-lane
    # feature vectors).
    wa_b = wa.astype(jnp.bfloat16)
    ba_p = ba
    if N_pad != num_items:
        wa_b = jnp.pad(wa_b, ((0, 0), (0, N_pad - num_items)))
        ba_p = jnp.pad(ba_p, ((0, 0), (0, N_pad - num_items)))
    wa_top = wa_b[:H, :]           # [H, N_pad]
    wa_bot = wa_b[H:, :]           # [F, N_pad]

    # --- precursor pallas_call: per-batch-tile MLP tower + GMF product ------
    pre_inputs = [mlp_in_p, ue_mf_p, ie_mf_p]
    pre_specs = [
        pl.BlockSpec((tb, L0), lambda i: (i, 0)),
        pl.BlockSpec((tb, F), lambda i: (i, 0)),
        pl.BlockSpec((tb, F), lambda i: (i, 0)),
    ]
    for w, b in zip(fc_ws, fc_bs):
        pre_inputs.extend([w, b])
        pre_specs.append(pl.BlockSpec(w.shape, lambda i: (0, 0)))
        pre_specs.append(pl.BlockSpec(b.shape, lambda i: (0, 0)))

    x_b, mf_b = pl.pallas_call(
        functools.partial(_vec_kernel, num_fc),
        out_shape=(jax.ShapeDtypeStruct((B_pad, H), jnp.bfloat16),
                   jax.ShapeDtypeStruct((B_pad, F), jnp.bfloat16)),
        grid=(nb,),
        in_specs=pre_specs,
        out_specs=(pl.BlockSpec((tb, H), lambda i: (i, 0)),
                   pl.BlockSpec((tb, F), lambda i: (i, 0))),
        compiler_params=pltpu.CompilerParams(
            dimension_semantics=("parallel",)),
    )(*pre_inputs)

    # --- main pallas_call: streamed affine output + sigmoid ------------------
    per_step = (tb * tn * 2            # output tile (bf16)
                + LF * tn * 2          # wa_top + wa_bot tiles (bf16)
                + tn * 4               # bias tile (f32)
                + tb * LF * 2)         # batch-tile features (bf16)
    vmem_bytes = min(2 * per_step + (4 << 20), 40 << 20)   # <= ~40 MiB for v7x
    vmem_bytes = max(vmem_bytes, 8 << 20)

    flops = 2 * nb * tb * nj * tn * LF
    bytes_accessed = (nb * LF * N_pad * 2        # wa re-streamed per batch tile
                      + nb * N_pad * 4           # bias re-streamed per batch tile
                      + B_pad * LF * 2           # feature slabs
                      + B_pad * N_pad * 2)       # bf16 output
    cost = pl.CostEstimate(flops=int(flops),
                           transcendentals=int(B_pad * N_pad),
                           bytes_accessed=int(bytes_accessed))

    out = pl.pallas_call(
        _affine_kernel,
        out_shape=jax.ShapeDtypeStruct((B_pad, N_pad), jnp.bfloat16),
        grid=(nb, nj),
        in_specs=[
            pl.BlockSpec((tb, H), lambda i, j: (i, 0)),
            pl.BlockSpec((tb, F), lambda i, j: (i, 0)),
            pl.BlockSpec((H, tn), lambda i, j: (0, j)),
            pl.BlockSpec((F, tn), lambda i, j: (0, j)),
            pl.BlockSpec((1, tn), lambda i, j: (0, j)),
        ],
        out_specs=pl.BlockSpec((tb, tn), lambda i, j: (i, j)),
        compiler_params=pltpu.CompilerParams(
            dimension_semantics=("parallel", "parallel"),
            vmem_limit_bytes=int(vmem_bytes)),
        cost_estimate=cost,
    )(x_b, mf_b, wa_top, wa_bot, ba_p)
    return out[:B, :num_items]


# --------------------------- parameter creation ------------------------------

def init_params(key, num_users, num_items, factor_num_mf, layers):
    factor_num_mlp = layers[0] // 2
    keys = jax.random.split(key, 8 + 2 * len(layers))
    ki = iter(keys)

    def normal(k, shape):
        return 0.01 * jax.random.normal(k, shape, dtype=jnp.float32)

    def xavier(k, fan_in, fan_out):
        bound = (6.0 / (fan_in + fan_out)) ** 0.5
        # stored as [in, out] (transpose of PyTorch [out, in]); distribution is
        # symmetric so this matches xavier_uniform_ semantics.
        return jax.random.uniform(k, (fan_in, fan_out), jnp.float32,
                                  -bound, bound)

    params = {
        "emb_user_mlp": normal(next(ki), (num_users, factor_num_mlp)),
        "emb_item_mlp": normal(next(ki), (num_items, factor_num_mlp)),
        "emb_user_mf": normal(next(ki), (num_users, factor_num_mf)),
        "emb_item_mf": normal(next(ki), (num_items, factor_num_mf)),
    }
    fc_ws, fc_bs = [], []
    for in_size, out_size in zip(layers[:-1], layers[1:]):
        fc_ws.append(xavier(next(ki), in_size, out_size))
        fc_bs.append(jnp.zeros((1, out_size), jnp.float32))
    params["fc_ws"] = fc_ws
    params["fc_bs"] = fc_bs

    affine_in = layers[-1] + factor_num_mf
    params["wa"] = xavier(next(ki), affine_in, num_items)   # [in, num_items]
    params["ba"] = jnp.zeros((1, num_items), jnp.float32)
    return params


# -------------------------- pure-JAX reference -------------------------------

def neumf_reference(params, user_indices, item_indices):
    ue_mlp = jnp.take(params["emb_user_mlp"], user_indices, axis=0)
    ie_mlp = jnp.take(params["emb_item_mlp"], item_indices, axis=0)
    ue_mf = jnp.take(params["emb_user_mf"], user_indices, axis=0)
    ie_mf = jnp.take(params["emb_item_mf"], item_indices, axis=0)
    x = jnp.concatenate([ue_mlp, ie_mlp], axis=-1)
    for w, b in zip(params["fc_ws"], params["fc_bs"]):
        x = jnp.maximum(x @ w + b, 0.0)
    mf = ue_mf * ie_mf
    vec = jnp.concatenate([x, mf], axis=-1)
    logits = vec @ params["wa"] + params["ba"]
    return jax.nn.sigmoid(logits)


# --------------------------------- main ---------------------------------------

if __name__ == "__main__":
    # Small config consistent with NeuMF: layers[0] = 2 * factor_num_mlp.
    # Shapes intentionally non-aligned (batch not a multiple of 16, num_items
    # not a multiple of 128) to exercise the padding / multi-tile grid path.
    num_users = 16
    num_items = 300
    factor_num_mf = 8
    layers = [32, 16, 8]          # factor_num_mlp = 16
    batch = 20

    key = jax.random.PRNGKey(0)
    pkey, ukey, ikey = jax.random.split(key, 3)
    params = init_params(pkey, num_users, num_items, factor_num_mf, layers)

    user_idx = jax.random.randint(ukey, (batch,), 0, num_users, dtype=jnp.int32)
    item_idx = jax.random.randint(ikey, (batch,), 0, num_items, dtype=jnp.int32)

    ref = neumf_reference(params, user_idx, item_idx)

    # Explicit small tiles: exercises a multi-tile (2 x 3) grid and padded rows.
    rating = neumf_forward(params, user_idx, item_idx, tb=16, tn=128)
    rating = jax.block_until_ready(rating)
    assert rating.shape == (batch, num_items)
    assert rating.dtype == jnp.bfloat16
    # bf16 weights / features / output -> relaxed tolerance vs f32 reference.
    assert jnp.allclose(rating.astype(jnp.float32), ref,
                        atol=1.5e-2, rtol=2e-2), "mismatch vs reference (tiled)"

    # Default (large-tile) path.
    rating2 = jax.block_until_ready(neumf_forward(params, user_idx, item_idx))
    assert jnp.allclose(rating2.astype(jnp.float32), ref,
                        atol=1.5e-2, rtol=2e-2), "mismatch vs reference (default)"

    print("KERNEL_OK")
</pallas_src>

<mosaic_0001>
module attributes {stable_mosaic.version = 11 : i64} {
  func.func @_vec_kernel(%arg0: i32, %arg1: memref<16x32xf32, #tpu.memory_space<vmem>>, %arg2: memref<16x8xf32, #tpu.memory_space<vmem>>, %arg3: memref<16x8xf32, #tpu.memory_space<vmem>>, %arg4: memref<32x16xf32, #tpu.memory_space<vmem>>, %arg5: memref<1x16xf32, #tpu.memory_space<vmem>>, %arg6: memref<16x8xf32, #tpu.memory_space<vmem>>, %arg7: memref<1x8xf32, #tpu.memory_space<vmem>>, %arg8: memref<16x8xbf16, #tpu.memory_space<vmem>>, %arg9: memref<16x8xbf16, #tpu.memory_space<vmem>>) attributes {dimension_semantics = [#tpu.dimension_semantics<parallel>], iteration_bounds = array<i64: 2>, scalar_prefetch = 0 : i64, scratch_operands = 0 : i64, tpu.core_type = #tpu.core_type<tc>, window_params = [{transform_indices = @transform_0, window_bounds = array<i64: 16, 32>}, {transform_indices = @transform_1, window_bounds = array<i64: 16, 8>}, {transform_indices = @transform_2, window_bounds = array<i64: 16, 8>}, {pipeline_mode = #tpu.pipeline_mode<synchronous>, transform_indices = @transform_3, window_bounds = array<i64: 32, 16>}, {pipeline_mode = #tpu.pipeline_mode<synchronous>, transform_indices = @transform_4, window_bounds = array<i64: 1, 16>}, {pipeline_mode = #tpu.pipeline_mode<synchronous>, transform_indices = @transform_5, window_bounds = array<i64: 16, 8>}, {pipeline_mode = #tpu.pipeline_mode<synchronous>, transform_indices = @transform_6, window_bounds = array<i64: 1, 8>}, {transform_indices = @transform_7, window_bounds = array<i64: 16, 8>}, {transform_indices = @transform_8, window_bounds = array<i64: 16, 8>}]} {
    %c0 = arith.constant 0 : index
    %c0_0 = arith.constant 0 : index
    %0 = vector.load %arg1[%c0, %c0_0] : memref<16x32xf32, #tpu.memory_space<vmem>>, vector<16x32xf32>
    %c0_1 = arith.constant 0 : index
    %c0_2 = arith.constant 0 : index
    %1 = vector.load %arg4[%c0_1, %c0_2] : memref<32x16xf32, #tpu.memory_space<vmem>>, vector<32x16xf32>
    %c0_3 = arith.constant 0 : index
    %c0_4 = arith.constant 0 : index
    %2 = vector.load %arg5[%c0_3, %c0_4] : memref<1x16xf32, #tpu.memory_space<vmem>>, vector<1x16xf32>
    %cst = arith.constant dense<0.000000e+00> : vector<16x16xf32>
    %3 = tpu.matmul %0, %1, %cst {dimension_numbers = #tpu.dot_dimension_numbers<[1], [0], [0], [1], [0, 0, 1, 1], [], []>} : vector<16x32xf32>, vector<32x16xf32>, vector<16x16xf32> -> vector<16x16xf32>
    %4 = vector.broadcast %2 : vector<1x16xf32> to vector<16x16xf32>
    %5 = arith.addf %3, %4 : vector<16x16xf32>
    %cst_5 = arith.constant 0.000000e+00 : f32
    %6 = vector.broadcast %cst_5 : f32 to vector<16x16xf32>
    %7 = arith.maximumf %5, %6 : vector<16x16xf32>
    %c0_6 = arith.constant 0 : index
    %c0_7 = arith.constant 0 : index
    %8 = vector.load %arg6[%c0_6, %c0_7] : memref<16x8xf32, #tpu.memory_space<vmem>>, vector<16x8xf32>
    %c0_8 = arith.constant 0 : index
    %c0_9 = arith.constant 0 : index
    %9 = vector.load %arg7[%c0_8, %c0_9] : memref<1x8xf32, #tpu.memory_space<vmem>>, vector<1x8xf32>
    %cst_10 = arith.constant dense<0.000000e+00> : vector<16x8xf32>
    %10 = tpu.matmul %7, %8, %cst_10 {dimension_numbers = #tpu.dot_dimension_numbers<[1], [0], [0], [1], [0, 0, 1, 1], [], []>} : vector<16x16xf32>, vector<16x8xf32>, vector<16x8xf32> -> vector<16x8xf32>
    %11 = vector.broadcast %9 : vector<1x8xf32> to vector<16x8xf32>
    %12 = arith.addf %10, %11 : vector<16x8xf32>
    %cst_11 = arith.constant 0.000000e+00 : f32
    %13 = vector.broadcast %cst_11 : f32 to vector<16x8xf32>
    %14 = arith.maximumf %12, %13 : vector<16x8xf32>
    %c0_12 = arith.constant 0 : index
    %c0_13 = arith.constant 0 : index
    %15 = vector.load %arg2[%c0_12, %c0_13] : memref<16x8xf32, #tpu.memory_space<vmem>>, vector<16x8xf32>
    %c0_14 = arith.constant 0 : index
    %c0_15 = arith.constant 0 : index
    %16 = vector.load %arg3[%c0_14, %c0_15] : memref<16x8xf32, #tpu.memory_space<vmem>>, vector<16x8xf32>
    %17 = arith.mulf %15, %16 : vector<16x8xf32>
    %18 = arith.truncf %14 : vector<16x8xf32> to vector<16x8xbf16>
    %c0_16 = arith.constant 0 : index
    %c0_17 = arith.constant 0 : index
    %19 = vector.load %arg8[%c0_16, %c0_17] : memref<16x8xbf16, #tpu.memory_space<vmem>>, vector<16x8xbf16>
    tpu.vector_store %arg8[%c0_16, %c0_17], %18 {strides = array<i32>} : memref<16x8xbf16, #tpu.memory_space<vmem>>, vector<16x8xbf16>,
    %20 = arith.truncf %17 : vector<16x8xf32> to vector<16x8xbf16>
    %c0_18 = arith.constant 0 : index
    %c0_19 = arith.constant 0 : index
    %21 = vector.load %arg9[%c0_18, %c0_19] : memref<16x8xbf16, #tpu.memory_space<vmem>>, vector<16x8xbf16>
    tpu.vector_store %arg9[%c0_18, %c0_19], %20 {strides = array<i32>} : memref<16x8xbf16, #tpu.memory_space<vmem>>, vector<16x8xbf16>,
    return
  }
  func.func @transform_0(%arg0: i32) -> (i32, i32) {
    %c0_i32 = arith.constant 0 : i32
    %c0_i32_0 = arith.constant 0 : i32
    return %arg0, %c0_i32 : i32, i32
  }
  func.func @transform_1(%arg0: i32) -> (i32, i32) {
    %c0_i32 = arith.constant 0 : i32
    %c0_i32_0 = arith.constant 0 : i32
    return %arg0, %c0_i32 : i32, i32
  }
  func.func @transform_2(%arg0: i32) -> (i32, i32) {
    %c0_i32 = arith.constant 0 : i32
    %c0_i32_0 = arith.constant 0 : i32
    return %arg0, %c0_i32 : i32, i32
  }
  func.func @transform_3(%arg0: i32) -> (i32, i32) {
    %c0_i32 = arith.constant 0 : i32
    %c0_i32_0 = arith.constant 0 : i32
    %c0_i32_1 = arith.constant 0 : i32
    return %c0_i32, %c0_i32_0 : i32, i32
  }
  func.func @transform_4(%arg0: i32) -> (i32, i32) {
    %c0_i32 = arith.constant 0 : i32
    %c0_i32_0 = arith.constant 0 : i32
    %c0_i32_1 = arith.constant 0 : i32
    return %c0_i32, %c0_i32_0 : i32, i32
  }
  func.func @transform_5(%arg0: i32) -> (i32, i32) {
    %c0_i32 = arith.constant 0 : i32
    %c0_i32_0 = arith.constant 0 : i32
    %c0_i32_1 = arith.constant 0 : i32
    return %c0_i32, %c0_i32_0 : i32, i32
  }
  func.func @transform_6(%arg0: i32) -> (i32, i32) {
    %c0_i32 = arith.constant 0 : i32
    %c0_i32_0 = arith.constant 0 : i32
    %c0_i32_1 = arith.constant 0 : i32
    return %c0_i32, %c0_i32_0 : i32, i32
  }
  func.func @transform_7(%arg0: i32) -> (i32, i32) {
    %c0_i32 = arith.constant 0 : i32
    %c0_i32_0 = arith.constant 0 : i32
    return %arg0, %c0_i32 : i32, i32
  }
  func.func @transform_8(%arg0: i32) -> (i32, i32) {
    %c0_i32 = arith.constant 0 : i32
    %c0_i32_0 = arith.constant 0 : i32
    return %arg0, %c0_i32 : i32, i32
  }
}

</mosaic_0001>

<bundles_post_ra>
// kernel: tpu_custom_call.1
= control target key start
LH: loop header
LB: loop body
LE: loop exit
PB: predicated region body
PF: predicated region fallthrough
CT: control target
= control target key end

     0   :  { %s830_s27 = smov 0   ;;  %s884_s0 = inlined_call_operand.vmem [shape: f32[32,32], index: 0, kind: input, shape index: {}]   ;;  %s885_s1 = inlined_call_operand.vmem [shape: f32[32,8], index: 1, kind: input, shape index: {}]   ;;  %s886_s2 = inlined_call_operand.vmem [shape: f32[32,8], index: 2, kind: input, shape index: {}]   ;;  %s887_s3 = inlined_call_operand.vmem [shape: f32[32,16], index: 3, kind: input, shape index: {}]   ;;  %s888_s4 = inlined_call_operand.vmem [shape: f32[1,16], index: 4, kind: input, shape index: {}]   ;;  %s889_s5 = inlined_call_operand.vmem [shape: f32[16,8], index: 5, kind: input, shape index: {}]   ;;  %s890_s6 = inlined_call_operand.vmem [shape: f32[1,8], index: 6, kind: input, shape index: {}]   ;;  %s891_s7 = inlined_call_operand.vmem [shape: bf16[32,8], index: 7, kind: output, shape index: {0}]   ;;  %s892_s8 = inlined_call_operand.vmem [shape: bf16[32,8], index: 8, kind: output, shape index: {1}]  }
   0x1 LB: > { %s698_s28 = sadd.s32 4294967295, %s783_s27   ;;  %p702_p0 = scmp.ge.s32.totalorder %s783_s27, 1  ;;  %s783_s27 = sphi %s830_s27, %s19_s27  }
   0x2   : > { %p288_p1 = scmp.lt.s32.totalorder %s783_s27, 3 }
   0x4   : > { %p289_p2 = pnand %p702_p0, %p288_p1 }
   0x5   : > { %v369_v0 = vld [vmem:[%s887_s3] sm:$0xff] (!%p289_p2)  ;;  %v370_v1 = vld [vmem:[%s887_s3 + $0x8] sm:$0xff] (!%p289_p2)  ;;  %v371_v2 = vld [vmem:[%s887_s3 + $0x10] sm:$0xff] (!%p289_p2)  ;;  %s703_s13 = sshll.u32 (!%p289_p2), %s698_s28, 1  ;;  %vm380_vm0 = vcmask (!%p289_p2), 261120   ;;  %vm473_vm1 = vcmask (!%p289_p2), 130048  }
   0x6   : > { %292 = sbr.rel (%p289_p2) target bundleno = 456 (0x1c8), region = 48  ;;  %v757_v3 = vpack.c.bf16 (!%p289_p2), %v370_v1, %v369_v0  ;;  %v372_v4 = vld [vmem:[%s887_s3 + $0x18] sm:$0xff] (!%p289_p2)  ;;  %p338_p3 = scmp.lt.s32.totalorder (!%p289_p2), %s703_s13, 3  ;;  %v464_v8 = vld [vmem:[%s889_s5] sm:$0xff] (!%p289_p2)  ;;  %v465_v9 = vld [vmem:[%s889_s5 + $0x8] sm:$0xff] (!%p289_p2)  ;;  %vm571_vm2 = vcmask (!%p289_p2), 60416  }
   0x7   : > { %v761_v5 = vpack.c.bf16 (!%p289_p2), %v372_v4, %v371_v2  ;;  %v765_v10 = vpack.c.bf16 (!%p289_p2), %v465_v9, %v464_v8  ;;  %v713_v11 = vld [vmem:[%s888_s4] ss:$0 sm:$0xff] (!%p289_p2) }
   0x8   : > { %758 = vmatprep.subr.bf16.mxu0 (!%p289_p2), %v757_v3  ;;  %v716_v26 = vld [vmem:[%s890_s6] ss:$0 sm:$0xff] (!%p289_p2) }
   0x9   : > { %760 = vmatpush3.bf16.msra.mxu0 (!%p289_p2), %v757_v3  ;;  %766 = vmatprep.subr.bf16.mxu1 (!%p289_p2), %v765_v10 }
   0xa   : > { %762 = vmatprep.subr.bf16.mxu0 (!%p289_p2), %v761_v5  ;;  %768 = vmatpush3.bf16.msra.mxu1 (!%p289_p2), %v765_v10 }
   0xd   : > { %s894_s13 = smov (!%p338_p3, %s703_s13), 3  ;;  %764 = vmatpush3.bf16.msra.mxu0 %v761_v5 }
   0xe   : > { %s704_s16 = sshll.u32 %s894_s13, 3  ;;  %s710_s11 = sshll.u32 %s894_s13, 2 }
   0xf   : > { %s341_s19 = scalar_lea.vmem %s884_s0, %s704_s16  ;;  %s347_s29 = scalar_lea.vmem %s885_s1, %s704_s16 }
  0x10   : > { %v367_v6 = vld [vmem:[%s341_s19] sm:$0xff]  ;;  %v368_v7 = vld [vmem:[%s341_s19 + $0x8] sm:$0xff]  ;;  %s353_s10 = scalar_lea.vmem %s886_s2, %s704_s16  ;;  %s365_s15 = scalar_lea.vmem %s892_s8, %s710_s11 }
  0x11   : > { %747 = vmatprep.mubr.msk.f32.mxu0 %vm380_vm0, %v367_v6  ;;  %v557_v18 = vld [vmem:[%s347_s29] sm:$0xff]  ;;  %v558_v20 = vld [vmem:[%s347_s29 + $0x8] sm:$0xff]  ;;  %s359_s19 = scalar_lea.vmem %s891_s7, %s710_s11 }
  0x12   : > { %748 = vmatmul.mubr.msk.f32.vlgmr.msra.gmra.mrb[0].mxu0 %vm380_vm0, %v368_v7  ;;  %v559_v19 = vld [vmem:[%s353_s10] sm:$0xff]  ;;  %v560_v21 = vld [vmem:[%s353_s10 + $0x8] sm:$0xff] }
  0x13   : > { %v561_v22 = vmul.f32 %v559_v19, %v557_v18  ;;  %v562_v23 = vmul.f32 %v560_v21, %v558_v20 }
  0x15   : > { %v727_v24 = vpack.c.bf16 %v561_v22, %v561_v22  ;;  %v728_v25 = vpack.c.bf16 %v562_v23, %v562_v23 }
  0x17   : > { %582 = vst.msk [vmem:[%s365_s15] sm:$0xf] %vm571_vm2, %v727_v24  ;;  %583 = vst.msk [vmem:[%s365_s15 + $0x4] sm:$0xf] %vm571_vm2, %v728_v25 }
  0xe5   : > { %v749_v12 = vpop.f32.mrb[0].mxu0 }
  0xe6   : > { %v459_v13 = vadd.f32 %v749_v12, %v713_v11  ;;  %v453_v14 = vpop.f32.mrb[1].mxu0 }
  0xe7   : > { %v454_v15 = vadd.f32 %v713_v11, %v453_v14 }
  0xe8   : > { %v463_v17 = vmax.f32 %v459_v13, 0.0 }
  0xe9   : > { %v462_v16 = vmax.f32 %v454_v15, 0.0 }
  0xeb   : > { %754 = vmatprep.mubr.msk.f32.mxu1 %vm473_vm1, %v462_v16 }
  0xec   : > { %755 = vmatmul.mubr.msk.f32.vlgmr.msra.gmra.mrb[0].mxu1 %vm473_vm1, %v463_v17 }
 0x1bf   : > { %v756_v27 = vpop.f32.mrb[0].mxu1 }
 0x1c0   : > { %v552_v28 = vadd.f32 %v756_v27, %v716_v26  ;;  %v546_v29 = vpop.f32.mrb[1].mxu1 }
 0x1c1   : > { %v547_v30 = vadd.f32 %v716_v26, %v546_v29 }
 0x1c2   : > { %v556_v31 = vmax.f32 %v552_v28, 0.0 }
 0x1c3   : > { %v555_v32 = vmax.f32 %v547_v30, 0.0 }
 0x1c4   : > { %v726_v34 = vpack.c.bf16 %v556_v31, %v556_v31 }
 0x1c5   : > { %v725_v33 = vpack.c.bf16 %v555_v32, %v555_v32 }
 0x1c6   : > { %573 = vst.msk [vmem:[%s359_s19 + $0x4] sm:$0xf] %vm571_vm2, %v726_v34 }
 0x1c7   : > { %572 = vst.msk [vmem:[%s359_s19] sm:$0xf] %vm571_vm2, %v725_v33 }
 0x1c8 PF: > { %s19_s27 = sadd.s32 1, %s783_s27  }
 0x1c9   : > { %p16_p4 = scmp.ge.s32.totalorder %s19_s27, 4  }
 0x1cb   :  { %18 = sbr.rel (!%p16_p4) target bundleno = 1 (0x1), region = 96 }

</bundles_post_ra>
